<compile_context>
chip_gen: v7x
topology: tpu7x:2x2x1
jax: 0.10.0
libtpu: 0.0.40
codegen_flags: <defaults>
</compile_context>

<pallas_src>
import functools

import jax
import jax.numpy as jnp
from jax.experimental import pallas as pl
from jax.experimental.pallas import tpu as pltpu


# ----------------------------------------------------------------------------
# Fused Pallas kernel: relu(x@W1+b1) -> relu(.@W2+b2) -> head
# ----------------------------------------------------------------------------
def _fused_mlp_kernel(x_ref, w1_ref, b1_ref, w2_ref, b2_ref, w3_ref, b3_ref,
                      o_ref, *, duel, num_action):
    # fc1 + relu  (bf16 operands on MXU, fp32 accumulate, fp32 epilogue)
    h = jnp.dot(x_ref[...], w1_ref[...], preferred_element_type=jnp.float32)
    h = jnp.maximum(h + b1_ref[...], 0.0)

    # fc2 + relu
    h = jnp.dot(h.astype(jnp.bfloat16), w2_ref[...],
                preferred_element_type=jnp.float32)
    h = jnp.maximum(h + b2_ref[...], 0.0)

    # head: for duel, w3/b3 hold [fc3 | fc4] concatenated -> one GEMM
    out = jnp.dot(h.astype(jnp.bfloat16), w3_ref[...],
                  preferred_element_type=jnp.float32)
    out = out + b3_ref[...]

    if duel:
        q = out[:, :num_action]                     # advantage stream
        v = out[:, num_action:num_action + 1]       # value stream (N=1)
        q = q - jnp.max(q, axis=1, keepdims=True)
        out = q + v

    o_ref[...] = out.astype(o_ref.dtype)


# ----------------------------------------------------------------------------
# Host-side helpers
# ----------------------------------------------------------------------------
def _round_up(a, m):
    return (a + m - 1) // m * m


def init_params(state_size, action_size, hidden=(64, 64), duel=False, key=None):
    """PyTorch nn.Linear-style init, weights stored (out_features, in_features)."""
    def linear(k, fan_in, fan_out):
        k1, k2 = jax.random.split(k)
        bound = 1.0 / float(fan_in) ** 0.5
        w = jax.random.uniform(k1, (fan_out, fan_in), jnp.float32, -bound, bound)
        b = jax.random.uniform(k2, (fan_out,), jnp.float32, -bound, bound)
        return w, b

    ks = jax.random.split(key, 4)
    p = {}
    p["w_fc1"], p["b_fc1"] = linear(ks[0], state_size, hidden[0])
    p["w_fc2"], p["b_fc2"] = linear(ks[1], hidden[0], hidden[1])
    p["w_fc3"], p["b_fc3"] = linear(ks[2], hidden[1], action_size)
    if duel:
        p["w_fc4"], p["b_fc4"] = linear(ks[3], hidden[1], 1)
    return p


def prepare_params(params, duel):
    """One-time prep: transpose to (in, out), cast weights to bf16, biases to
    fp32 (1, N) rows, and fuse fc3/fc4 into a single head GEMM for duel."""
    prep = {
        "w1": params["w_fc1"].T.astype(jnp.bfloat16),
        "b1": params["b_fc1"].reshape(1, -1).astype(jnp.float32),
        "w2": params["w_fc2"].T.astype(jnp.bfloat16),
        "b2": params["b_fc2"].reshape(1, -1).astype(jnp.float32),
    }
    if duel:
        w_head = jnp.concatenate([params["w_fc3"], params["w_fc4"]], axis=0)
        b_head = jnp.concatenate([params["b_fc3"], params["b_fc4"]], axis=0)
    else:
        w_head = params["w_fc3"]
        b_head = params["b_fc3"]
    prep["w3"] = w_head.T.astype(jnp.bfloat16)
    prep["b3"] = b_head.reshape(1, -1).astype(jnp.float32)
    return prep


@functools.partial(jax.jit, static_argnames=("duel", "num_action", "block_m"))
def q_forward(x, prep, *, duel, num_action, block_m=128):
    """Pallas implementation of Q_Network.forward. x: (B, state_size)."""
    B, S = x.shape
    H0 = prep["w1"].shape[1]
    H1 = prep["w2"].shape[1]
    Nh = prep["w3"].shape[1]          # num_action (+1 if duel)

    # Row tile: multiple of 8, capped at block_m; pad batch up to the tile.
    bm = min(block_m, _round_up(max(B, 1), 8))
    Bp = _round_up(B, bm)

    xp = x.astype(jnp.bfloat16)
    if Bp != B:
        xp = jnp.pad(xp, ((0, Bp - B), (0, 0)))

    out = pl.pallas_call(
        functools.partial(_fused_mlp_kernel, duel=duel, num_action=num_action),
        out_shape=jax.ShapeDtypeStruct((Bp, num_action), jnp.float32),
        grid=(Bp // bm,),
        in_specs=[
            pl.BlockSpec((bm, S), lambda i: (i, 0)),      # activations: row-tiled
            pl.BlockSpec((S, H0), lambda i: (0, 0)),      # weights: VMEM-resident
            pl.BlockSpec((1, H0), lambda i: (0, 0)),
            pl.BlockSpec((H0, H1), lambda i: (0, 0)),
            pl.BlockSpec((1, H1), lambda i: (0, 0)),
            pl.BlockSpec((H1, Nh), lambda i: (0, 0)),
            pl.BlockSpec((1, Nh), lambda i: (0, 0)),
        ],
        out_specs=pl.BlockSpec((bm, num_action), lambda i: (i, 0)),
        compiler_params=pltpu.CompilerParams(
            dimension_semantics=("parallel",),            # 2 TCs on v7x
            vmem_limit_bytes=64 * 1024 * 1024,
        ),
    )(xp, prep["w1"], prep["b1"], prep["w2"], prep["b2"], prep["w3"], prep["b3"])

    return out[:B] if Bp != B else out


# ----------------------------------------------------------------------------
# Plain-JAX fp32 reference (mirrors the PyTorch module)
# ----------------------------------------------------------------------------
def reference_forward(x, params, duel=False):
    h = jax.nn.relu(x @ params["w_fc1"].T + params["b_fc1"])
    h = jax.nn.relu(h @ params["w_fc2"].T + params["b_fc2"])
    q = h @ params["w_fc3"].T + params["b_fc3"]
    if duel:
        q = q - jnp.max(q, axis=1, keepdims=True)
        v = h @ params["w_fc4"].T + params["b_fc4"]
        return q + v
    return q


if __name__ == "__main__":
    key = jax.random.PRNGKey(0)
    k_x, k_x2, k_p, k_pd = jax.random.split(key, 4)

    state_size, action_size, hidden = 8, 6, (64, 64)
    B = 2
    x = jax.random.normal(k_x, (B, state_size), jnp.float32)

    # ---- duel=False path ----------------------------------------------------
    params = init_params(state_size, action_size, hidden, duel=False, key=k_p)
    prep = prepare_params(params, duel=False)
    out = jax.block_until_ready(
        q_forward(x, prep, duel=False, num_action=action_size))
    ref = reference_forward(x, params, duel=False)
    assert out.shape == (B, action_size)
    assert jnp.allclose(out, ref, rtol=2e-2, atol=2e-2), (
        float(jnp.max(jnp.abs(out - ref))))

    # ---- duel=True path -----------------------------------------------------
    params_d = init_params(state_size, action_size, hidden, duel=True, key=k_pd)
    prep_d = prepare_params(params_d, duel=True)
    out_d = jax.block_until_ready(
        q_forward(x, prep_d, duel=True, num_action=action_size))
    ref_d = reference_forward(x, params_d, duel=True)
    assert out_d.shape == (B, action_size)
    assert jnp.allclose(out_d, ref_d, rtol=2e-2, atol=2e-2), (
        float(jnp.max(jnp.abs(out_d - ref_d))))

    # ---- larger batch: exercises row tiling (grid > 1) + padding ------------
    B2 = 300
    x2 = jax.random.normal(k_x2, (B2, state_size), jnp.float32)
    out2 = jax.block_until_ready(
        q_forward(x2, prep, duel=False, num_action=action_size))
    ref2 = reference_forward(x2, params, duel=False)
    assert out2.shape == (B2, action_size)
    assert jnp.allclose(out2, ref2, rtol=2e-2, atol=2e-2), (
        float(jnp.max(jnp.abs(out2 - ref2))))

    print("KERNEL_OK")
</pallas_src>

<mosaic_0001>
module attributes {stable_mosaic.version = 11 : i64} {
  func.func @_fused_mlp_kernel(%arg0: i32, %arg1: memref<8x8xbf16, #tpu.memory_space<vmem>>, %arg2: memref<8x64xbf16, #tpu.memory_space<vmem>>, %arg3: memref<1x64xf32, #tpu.memory_space<vmem>>, %arg4: memref<64x64xbf16, #tpu.memory_space<vmem>>, %arg5: memref<1x64xf32, #tpu.memory_space<vmem>>, %arg6: memref<64x6xbf16, #tpu.memory_space<vmem>>, %arg7: memref<1x6xf32, #tpu.memory_space<vmem>>, %arg8: memref<8x6xf32, #tpu.memory_space<vmem>>) attributes {dimension_semantics = [#tpu.dimension_semantics<parallel>], iteration_bounds = array<i64: 1>, scalar_prefetch = 0 : i64, scratch_operands = 0 : i64, tpu.core_type = #tpu.core_type<tc>, window_params = [{transform_indices = @transform_0, window_bounds = array<i64: 8, 8>}, {pipeline_mode = #tpu.pipeline_mode<synchronous>, transform_indices = @transform_1, window_bounds = array<i64: 8, 64>}, {pipeline_mode = #tpu.pipeline_mode<synchronous>, transform_indices = @transform_2, window_bounds = array<i64: 1, 64>}, {pipeline_mode = #tpu.pipeline_mode<synchronous>, transform_indices = @transform_3, window_bounds = array<i64: 64, 64>}, {pipeline_mode = #tpu.pipeline_mode<synchronous>, transform_indices = @transform_4, window_bounds = array<i64: 1, 64>}, {pipeline_mode = #tpu.pipeline_mode<synchronous>, transform_indices = @transform_5, window_bounds = array<i64: 64, 6>}, {pipeline_mode = #tpu.pipeline_mode<synchronous>, transform_indices = @transform_6, window_bounds = array<i64: 1, 6>}, {transform_indices = @transform_7, window_bounds = array<i64: 8, 6>}]} {
    %c0 = arith.constant 0 : index
    %c0_0 = arith.constant 0 : index
    %0 = vector.load %arg1[%c0, %c0_0] : memref<8x8xbf16, #tpu.memory_space<vmem>>, vector<8x8xbf16>
    %c0_1 = arith.constant 0 : index
    %c0_2 = arith.constant 0 : index
    %1 = vector.load %arg2[%c0_1, %c0_2] : memref<8x64xbf16, #tpu.memory_space<vmem>>, vector<8x64xbf16>
    %cst = arith.constant dense<0.000000e+00> : vector<8x64xf32>
    %2 = tpu.matmul %0, %1, %cst {dimension_numbers = #tpu.dot_dimension_numbers<[1], [0], [0], [1], [0, 0, 1, 1], [], []>} : vector<8x8xbf16>, vector<8x64xbf16>, vector<8x64xf32> -> vector<8x64xf32>
    %c0_3 = arith.constant 0 : index
    %c0_4 = arith.constant 0 : index
    %3 = vector.load %arg3[%c0_3, %c0_4] : memref<1x64xf32, #tpu.memory_space<vmem>>, vector<1x64xf32>
    %4 = vector.broadcast %3 : vector<1x64xf32> to vector<8x64xf32>
    %5 = arith.addf %2, %4 : vector<8x64xf32>
    %cst_5 = arith.constant 0.000000e+00 : f32
    %6 = vector.broadcast %cst_5 : f32 to vector<8x64xf32>
    %7 = arith.maximumf %5, %6 : vector<8x64xf32>
    %8 = arith.truncf %7 : vector<8x64xf32> to vector<8x64xbf16>
    %c0_6 = arith.constant 0 : index
    %c0_7 = arith.constant 0 : index
    %9 = vector.load %arg4[%c0_6, %c0_7] : memref<64x64xbf16, #tpu.memory_space<vmem>>, vector<64x64xbf16>
    %cst_8 = arith.constant dense<0.000000e+00> : vector<8x64xf32>
    %10 = tpu.matmul %8, %9, %cst_8 {dimension_numbers = #tpu.dot_dimension_numbers<[1], [0], [0], [1], [0, 0, 1, 1], [], []>} : vector<8x64xbf16>, vector<64x64xbf16>, vector<8x64xf32> -> vector<8x64xf32>
    %c0_9 = arith.constant 0 : index
    %c0_10 = arith.constant 0 : index
    %11 = vector.load %arg5[%c0_9, %c0_10] : memref<1x64xf32, #tpu.memory_space<vmem>>, vector<1x64xf32>
    %12 = vector.broadcast %11 : vector<1x64xf32> to vector<8x64xf32>
    %13 = arith.addf %10, %12 : vector<8x64xf32>
    %cst_11 = arith.constant 0.000000e+00 : f32
    %14 = vector.broadcast %cst_11 : f32 to vector<8x64xf32>
    %15 = arith.maximumf %13, %14 : vector<8x64xf32>
    %16 = arith.truncf %15 : vector<8x64xf32> to vector<8x64xbf16>
    %c0_12 = arith.constant 0 : index
    %c0_13 = arith.constant 0 : index
    %17 = vector.load %arg6[%c0_12, %c0_13] : memref<64x6xbf16, #tpu.memory_space<vmem>>, vector<64x6xbf16>
    %cst_14 = arith.constant dense<0.000000e+00> : vector<8x6xf32>
    %18 = tpu.matmul %16, %17, %cst_14 {dimension_numbers = #tpu.dot_dimension_numbers<[1], [0], [0], [1], [0, 0, 1, 1], [], []>} : vector<8x64xbf16>, vector<64x6xbf16>, vector<8x6xf32> -> vector<8x6xf32>
    %c0_15 = arith.constant 0 : index
    %c0_16 = arith.constant 0 : index
    %19 = vector.load %arg7[%c0_15, %c0_16] : memref<1x6xf32, #tpu.memory_space<vmem>>, vector<1x6xf32>
    %20 = vector.broadcast %19 : vector<1x6xf32> to vector<8x6xf32>
    %21 = arith.addf %18, %20 : vector<8x6xf32>
    %c0_17 = arith.constant 0 : index
    %c0_18 = arith.constant 0 : index
    %22 = vector.load %arg8[%c0_17, %c0_18] : memref<8x6xf32, #tpu.memory_space<vmem>>, vector<8x6xf32>
    tpu.vector_store %arg8[%c0_17, %c0_18], %21 {strides = array<i32>} : memref<8x6xf32, #tpu.memory_space<vmem>>, vector<8x6xf32>,
    return
  }
  func.func @transform_0(%arg0: i32) -> (i32, i32) {
    %c0_i32 = arith.constant 0 : i32
    %c0_i32_0 = arith.constant 0 : i32
    return %arg0, %c0_i32 : i32, i32
  }
  func.func @transform_1(%arg0: i32) -> (i32, i32) {
    %c0_i32 = arith.constant 0 : i32
    %c0_i32_0 = arith.constant 0 : i32
    %c0_i32_1 = arith.constant 0 : i32
    return %c0_i32, %c0_i32_0 : i32, i32
  }
  func.func @transform_2(%arg0: i32) -> (i32, i32) {
    %c0_i32 = arith.constant 0 : i32
    %c0_i32_0 = arith.constant 0 : i32
    %c0_i32_1 = arith.constant 0 : i32
    return %c0_i32, %c0_i32_0 : i32, i32
  }
  func.func @transform_3(%arg0: i32) -> (i32, i32) {
    %c0_i32 = arith.constant 0 : i32
    %c0_i32_0 = arith.constant 0 : i32
    %c0_i32_1 = arith.constant 0 : i32
    return %c0_i32, %c0_i32_0 : i32, i32
  }
  func.func @transform_4(%arg0: i32) -> (i32, i32) {
    %c0_i32 = arith.constant 0 : i32
    %c0_i32_0 = arith.constant 0 : i32
    %c0_i32_1 = arith.constant 0 : i32
    return %c0_i32, %c0_i32_0 : i32, i32
  }
  func.func @transform_5(%arg0: i32) -> (i32, i32) {
    %c0_i32 = arith.constant 0 : i32
    %c0_i32_0 = arith.constant 0 : i32
    %c0_i32_1 = arith.constant 0 : i32
    return %c0_i32, %c0_i32_0 : i32, i32
  }
  func.func @transform_6(%arg0: i32) -> (i32, i32) {
    %c0_i32 = arith.constant 0 : i32
    %c0_i32_0 = arith.constant 0 : i32
    %c0_i32_1 = arith.constant 0 : i32
    return %c0_i32, %c0_i32_0 : i32, i32
  }
  func.func @transform_7(%arg0: i32) -> (i32, i32) {
    %c0_i32 = arith.constant 0 : i32
    %c0_i32_0 = arith.constant 0 : i32
    return %arg0, %c0_i32 : i32, i32
  }
}

</mosaic_0001>

<bundles_post_ra>
// kernel: q_forward.1
= control target key start
LH: loop header
LB: loop body
LE: loop exit
PB: predicated region body
PF: predicated region fallthrough
CT: control target
= control target key end

     0   :  { %12 = vsyncpa [#allocation3], 0  ;;  %s781_s0 = inlined_call_operand.hbm [shape: bf16[8,8], index: 0, kind: input, shape index: {}]   ;;  %s782_s1 = inlined_call_operand.hbm [shape: bf16[8,64], index: 1, kind: input, shape index: {}]   ;;  %s783_s2 = inlined_call_operand.hbm [shape: f32[1,64], index: 2, kind: input, shape index: {}]   ;;  %s784_s3 = inlined_call_operand.hbm [shape: bf16[64,64], index: 3, kind: input, shape index: {}]   ;;  %s785_s4 = inlined_call_operand.hbm [shape: f32[1,64], index: 4, kind: input, shape index: {}]   ;;  %s786_s5 = inlined_call_operand.hbm [shape: bf16[64,6], index: 5, kind: input, shape index: {}]   ;;  %s787_s6 = inlined_call_operand.hbm [shape: f32[1,6], index: 6, kind: input, shape index: {}]   ;;  %s788_s7 = inlined_call_operand.hbm [shape: f32[8,6], index: 7, kind: output, shape index: {}]  }
   0x1   :  { %13 = vsyncpa [#allocation6], 0 }
   0x2   :  { %14 = vsyncpa [#allocation9], 0 }
   0x3   :  { %15 = vsyncpa [#allocation12], 0 }
   0x4   :  { %16 = vsyncpa [#allocation4], 0  ;;  %s621_s24 = smov [#allocation5]   ;;  %s622_s26 = smov [#allocation8]  }
   0x5   :  { %s33_s25 = sshll.u32 %s621_s24, 4  ;;  %s52_s27 = sshll.u32 %s622_s26, 4  ;;  %s34_s25 = int_to_ptr.vmem [resolvable:$true] %s33_s25  ;;  %s673_s27 = int_to_ptr.vmem [resolvable:$true] %s52_s27 }
   0x6   :  { %s435_s30 = scalar_lea.hbm %s782_s1, 64 }
   0x7   :  { %p436_p0 = scmp.ne.s32.totalorder %s782_s1, %s435_s30  ;;  %p439_p1 = scmp.lt.u32.totalorder %s435_s30, %s782_s1 }
   0x9   :  { %p441_p2 = pnand %p439_p1, %p436_p0 }
   0xb   :  { %444 = shalt.err (!%p441_p2)
}
   0xc   :  { %s445_s12 = scalar_lea.vmem %s34_s25, 64  ;;  %p450_p4 = scmp.lt.s32.totalorder %s34_s25, %s34_s25 }
   0xd   :  { %p446_p3 = scmp.ne.s32.totalorder %s34_s25, %s445_s12  ;;  %p451_p5 = scmp.lt.s32.totalorder %s445_s12, %s445_s12 }
   0xf   :  { %p452_p6 = por %p451_p5, %p450_p4 }
  0x11   :  { %p453_p7 = pnand %p452_p6, %p446_p3 }
  0x13   :  { %456 = shalt.err (!%p453_p7)
}
  0x14   :  { %36 = dma.hbm_to_vmem [thread:$0]  %s782_s1, 64, %s34_s25, [#allocation6]  }
  0x15   :  { %s457_s17 = scalar_lea.hbm %s784_s3, 512 }
  0x16   :  { %p458_p8 = scmp.ne.s32.totalorder %s784_s3, %s457_s17  ;;  %p461_p9 = scmp.lt.u32.totalorder %s457_s17, %s784_s3 }
  0x18   :  { %p463_p10 = pnand %p461_p9, %p458_p8 }
  0x1a   :  { %466 = shalt.err (!%p463_p10)
}
  0x1b   :  { %s467_s22 = scalar_lea.vmem %s673_s27, 512  ;;  %p472_p12 = scmp.lt.s32.totalorder %s673_s27, %s673_s27 }
  0x1c   :  { %p468_p11 = scmp.ne.s32.totalorder %s673_s27, %s467_s22  ;;  %p473_p13 = scmp.lt.s32.totalorder %s467_s22, %s467_s22 }
  0x1e   :  { %p474_p0 = por %p473_p13, %p472_p12 }
  0x20   :  { %p475_p1 = pnand %p474_p0, %p468_p11 }
  0x22   :  { %478 = shalt.err (!%p475_p1)
}
  0x23   :  { %s623_s1 = smov 64   ;;  %s624_s23 = smov 4  }
  0x24   :  { %58 = dma.hbm_to_vmem [thread:$0]  %s784_s3, 512, %s673_s27, [#allocation9], %s623_s1, %s623_s1, %s624_s23  }
  0x25   :  { %s625_s26 = smov [#allocation11]   ;;  %s626_s29 = smov [#allocation2]  }
  0x26   :  { %s74_s28 = sshll.u32 %s625_s26, 4  ;;  %s23_s30 = sshll.u32 %s626_s29, 4  ;;  %s75_s28 = int_to_ptr.vmem [resolvable:$true] %s74_s28  ;;  %s24_s30 = int_to_ptr.vmem [resolvable:$true] %s23_s30 }
  0x27   :  { %s479_s10 = scalar_lea.hbm %s786_s5, 512 }
  0x28   :  { %p480_p2 = scmp.ne.s32.totalorder %s786_s5, %s479_s10  ;;  %p483_p3 = scmp.lt.u32.totalorder %s479_s10, %s786_s5 }
  0x2a   :  { %p485_p4 = pnand %p483_p3, %p480_p2 }
  0x2c   :  { %488 = shalt.err (!%p485_p4)
}
  0x2d   :  { %s489_s3 = scalar_lea.vmem %s75_s28, 512  ;;  %p494_p6 = scmp.lt.s32.totalorder %s75_s28, %s75_s28 }
  0x2e   :  { %p490_p5 = scmp.ne.s32.totalorder %s75_s28, %s489_s3  ;;  %p495_p7 = scmp.lt.s32.totalorder %s489_s3, %s489_s3 }
  0x30   :  { %p496_p8 = por %p495_p7, %p494_p6 }
  0x32   :  { %p497_p9 = pnand %p496_p8, %p490_p5 }
  0x34   :  { %500 = shalt.err (!%p497_p9)
}
  0x35   :  { %80 = dma.hbm_to_vmem [thread:$0]  %s786_s5, 512, %s75_s28, [#allocation12], %s623_s1, %s623_s1, %s624_s23  }
  0x36   :  { %s501_s18 = scalar_lea.hbm %s781_s0, 64 }
  0x37   :  { %p502_p10 = scmp.ne.s32.totalorder %s781_s0, %s501_s18  ;;  %p505_p11 = scmp.lt.u32.totalorder %s501_s18, %s781_s0 }
  0x39   :  { %p507_p12 = pnand %p505_p11, %p502_p10 }
  0x3b   :  { %510 = shalt.err (!%p507_p12)
}
  0x3c   :  { %s511_s24 = scalar_lea.vmem %s24_s30, 64  ;;  %p516_p0 = scmp.lt.s32.totalorder %s24_s30, %s24_s30 }
  0x3d   :  { %p512_p13 = scmp.ne.s32.totalorder %s24_s30, %s511_s24  ;;  %p517_p1 = scmp.lt.s32.totalorder %s511_s24, %s511_s24 }
  0x3f   :  { %p518_p2 = por %p517_p1, %p516_p0 }
  0x41   :  { %p519_p3 = pnand %p518_p2, %p512_p13 }
  0x43   :  { %522 = shalt.err (!%p519_p3)
}
  0x44   :  { %26 = dma.hbm_to_vmem [thread:$0]  %s781_s0, 64, %s24_s30, [#allocation3]  }
  0x45   :  { %s627_s23 = smov [#allocation7]   ;;  %s628_s26 = smov [#allocation10]  }
  0x46   :  { %s43_s25 = sshll.u32 %s627_s23, 4  ;;  %s65_s28 = sshll.u32 %s628_s26, 4  ;;  %s44_s25 = int_to_ptr.vmem [resolvable:$true] %s43_s25  ;;  %s66_s28 = int_to_ptr.vmem [resolvable:$true] %s65_s28 }
  0x47   :  { %s523_s9 = scalar_lea.hbm %s783_s2, 16 }
  0x48   :  { %p524_p4 = scmp.ne.s32.totalorder %s783_s2, %s523_s9  ;;  %p527_p5 = scmp.lt.u32.totalorder %s523_s9, %s783_s2 }
  0x4a   :  { %p529_p6 = pnand %p527_p5, %p524_p4 }
  0x4c   :  { %532 = shalt.err (!%p529_p6)
}
  0x4d   :  { %s533_s0 = scalar_lea.vmem %s44_s25, 16  ;;  %s537_s30 = scalar_lea.vmem %s44_s25, 32 }
  0x4e   :  { %p534_p7 = scmp.ne.s32.totalorder %s44_s25, %s533_s0  ;;  %p538_p8 = scmp.lt.s32.totalorder %s44_s25, %s44_s25 }
  0x4f   :  { %p539_p9 = scmp.lt.s32.totalorder %s537_s30, %s533_s0 }
  0x51   :  { %p540_p10 = por %p539_p9, %p538_p8 }
  0x53   :  { %p541_p11 = pnand %p540_p10, %p534_p7 }
  0x55   :  { %544 = shalt.err (!%p541_p11)
}
  0x56   :  { %46 = dma.hbm_to_vmem [thread:$0]  %s783_s2, 16, %s44_s25, [#allocation6]  }
  0x57   :  { %s545_s16 = scalar_lea.hbm %s785_s4, 16 }
  0x58   :  { %p546_p12 = scmp.ne.s32.totalorder %s785_s4, %s545_s16  ;;  %p549_p13 = scmp.lt.u32.totalorder %s545_s16, %s785_s4 }
  0x5a   :  { %p551_p0 = pnand %p549_p13, %p546_p12 }
  0x5c   :  { %554 = shalt.err (!%p551_p0)
}
  0x5d   :  { %s555_s21 = scalar_lea.vmem %s66_s28, 16  ;;  %s559_s22 = scalar_lea.vmem %s66_s28, 32 }
  0x5e   :  { %p556_p1 = scmp.ne.s32.totalorder %s66_s28, %s555_s21  ;;  %p560_p2 = scmp.lt.s32.totalorder %s66_s28, %s66_s28 }
  0x5f   :  { %p561_p3 = scmp.lt.s32.totalorder %s559_s22, %s555_s21 }
  0x61   :  { %p562_p4 = por %p561_p3, %p560_p2 }
  0x63   :  { %p563_p5 = pnand %p562_p4, %p556_p1 }
  0x65   :  { %566 = shalt.err (!%p563_p5)
}
  0x66   :  { %68 = dma.hbm_to_vmem [thread:$0]  %s785_s4, 16, %s66_s28, [#allocation9]  }
  0x67   :  { %s629_s5 = smov [#allocation13]   ;;  %s567_s26 = scalar_lea.hbm %s787_s6, 16 }
  0x68   :  { %s87_s1 = sshll.u32 %s629_s5, 4  ;;  %p568_p6 = scmp.ne.s32.totalorder %s787_s6, %s567_s26  ;;  %s88_s1 = int_to_ptr.vmem [resolvable:$true] %s87_s1 }
  0x69   :  { %p571_p7 = scmp.lt.u32.totalorder %s567_s26, %s787_s6 }
  0x6b   :  { %p573_p8 = pnand %p571_p7, %p568_p6 }
  0x6d   :  { %576 = shalt.err (!%p573_p8)
}
  0x6e   :  { %s577_s11 = scalar_lea.vmem %s88_s1, 16  ;;  %s581_s4 = scalar_lea.vmem %s88_s1, 32 }
  0x6f   :  { %p578_p9 = scmp.ne.s32.totalorder %s88_s1, %s577_s11  ;;  %p582_p10 = scmp.lt.s32.totalorder %s88_s1, %s88_s1 }
  0x70   :  { %p583_p11 = scmp.lt.s32.totalorder %s581_s4, %s577_s11 }
  0x72   :  { %p584_p12 = por %p583_p11, %p582_p10 }
  0x74   :  { %p585_p13 = pnand %p584_p12, %p578_p9 }
  0x76   :  { %588 = shalt.err (!%p585_p13)
}
  0x77   :  { %90 = dma.hbm_to_vmem [thread:$0]  %s787_s6, 16, %s88_s1, [#allocation12]  }
  0x78   :  { %611 = dma.done.wait [#allocation3], 64  }
  0x79   :  { %612 = vsyncadd [#allocation3], 4294967232 }
  0x7a   :  { %613 = dma.done.wait [#allocation6], 80  }
  0x7b   :  { %614 = vsyncadd [#allocation6], 4294967216 }
  0x7c   :  { %615 = dma.done.wait [#allocation9], 528  }
  0x7d   :  { %616 = vsyncadd [#allocation9], 4294966768 }
  0x7e   :  { %617 = dma.done.wait [#allocation12], 528  }
  0x7f   :  { %618 = vsyncadd [#allocation12], 4294966768  ;;  %v630_v0 = vmov 0.0   ;;  %vm631_vm0 = vmmov 0   ;;  %vm126_vm1 = vcmask 1043456   ;;  %v427_v3 = vld [vmem:[#allocation8] sm:$0xff]  }
  0x80   :  { %385 = vmatprep.subr.bf16.mxu0 %v630_v0  ;;  %387 = vmatprep.mubr.msk.bf16.mxu0 %vm631_vm0, %v630_v0  ;;  %v114_v1 = vld [vmem:[#allocation5] sm:$0xf]  ;;  %v113_v4 = vld [vmem:[#allocation2] sm:$0xf]  ;;  %vm122_vm2 = vcmask 64512   ;;  %v428_v5 = vld [vmem:[#allocation8 + $0x8] sm:$0xff]  }
  0x81   :  { %391 = vmatprep.subr.bf16.mxu1 %v630_v0  ;;  %399 = vmatprep.mubr.msk.bf16.mxu1 %vm631_vm0, %v630_v0  ;;  %v128_v2 = vsel %vm126_vm1, %v114_v1, 0  ;;  %v429_v6 = vld [vmem:[#allocation8 + $0x10] sm:$0xff]   ;;  %v430_v7 = vld [vmem:[#allocation8 + $0x18] sm:$0xff]   ;;  %v431_v8 = vld [vmem:[#allocation11] sm:$0xff]   ;;  %vm211_vm3 = vcmask 523264   ;;  %s632_s6 = smov [#allocation14]  }
  0x82   :  { %386 = vmatpush3.bf16.msra.mxu0 %v128_v2  ;;  %392 = vmatpush3.bf16.msra.mxu1 %v427_v3  ;;  %v432_v9 = vld [vmem:[#allocation11 + $0x8] sm:$0xff]   ;;  %v359_v10 = vld [vmem:[#allocation7] ss:$0 sm:$0xff]  ;;  %v433_v18 = vld [vmem:[#allocation11 + $0x10] sm:$0xff]   ;;  %s347_s13 = sshll.u32 %s632_s6, 4  ;;  %vm339_vm4 = vcmask 48128   ;;  %s348_s13 = int_to_ptr.vmem [resolvable:$true] %s347_s13 }
  0x83   :  { %403 = vmatprep.subr.bf16.mxu0 %v630_v0  ;;  %393 = vmatprep.subr.bf16.mxu1 %v630_v0  ;;  %v434_v19 = vld [vmem:[#allocation11 + $0x18] sm:$0xff]   ;;  %v367_v28 = vld [vmem:[#allocation13] ss:$0 sm:$0xff]  ;;  %s589_s0 = scalar_lea.vmem %s348_s13, 128  ;;  %p594_p1 = scmp.lt.s32.totalorder %s348_s13, %s348_s13 }
  0x84   :  { %v361_v20 = vld [vmem:[#allocation10] ss:$0 sm:$0xff]  ;;  %p590_p0 = scmp.ne.s32.totalorder %s348_s13, %s589_s0  ;;  %p595_p2 = scmp.lt.s32.totalorder %s589_s0, %s589_s0 }
  0x85   :  { %388 = vmatmul.mubr.msk.bf16.vlgmr.msra.gmra.mrb[0].mxu0 %vm122_vm2, %v113_v4 }
  0x86   :  { %411 = vmatprep.mubr.msk.bf16.mxu0 %vm631_vm0, %v630_v0  ;;  %394 = vmatpush3.bf16.msra.mxu1 %v428_v5  ;;  %p596_p3 = por %p595_p2, %p594_p1 }
  0x87   :  { %395 = vmatprep.subr.bf16.mxu1 %v630_v0  ;;  %404 = vmatpush3.bf16.msra.mxu0 %v431_v8 }
  0x88   :  { %405 = vmatprep.subr.bf16.mxu0 %v630_v0  ;;  %p597_p4 = pnand %p596_p3, %p590_p0 }
  0x8a   :  { %396 = vmatpush3.bf16.msra.mxu1 %v429_v6 }
  0x8b   :  { %397 = vmatprep.subr.bf16.mxu1 %v630_v0  ;;  %406 = vmatpush3.bf16.msra.mxu0 %v432_v9 }
  0x8c   :  { %407 = vmatprep.subr.bf16.mxu0 %v630_v0 }
  0x8e   :  { %398 = vmatpush3.bf16.msra.mxu1 %v430_v7 }
  0x8f   :  { %408 = vmatpush3.bf16.msra.mxu0 %v433_v18 }
  0x90   :  { %409 = vmatprep.subr.bf16.mxu0 %v630_v0 }
  0x93   :  { %410 = vmatpush3.bf16.msra.mxu0 %v434_v19 }
 0x158   :  { %v164_v11 = vpop.f32.mrb[0].mxu0 }
 0x159   :  { %v165_v12 = vadd.f32 %v359_v10, %v164_v11  ;;  %v389_v13 = vpop.f32.mrb[1].mxu0 }
 0x15a   :  { %v167_v14 = vpop.f32.mrb[2].mxu0 }
 0x15b   :  { %v170_v15 = vmax.f32 %v165_v12, 0.0  ;;  %v390_v16 = vpop.f32.mrb[3].mxu0 }
 0x15d   :  { %v171_v17 = vpack.c.bf16 %v170_v15, %v170_v15 }
 0x15f   :  { %400 = vmatmul.mubr.msk.bf16.vlgmr.msra.gmra.mrb[0].mxu1 %vm211_vm3, %v171_v17 }
 0x232   :  { %v249_v21 = vpop.f32.mrb[0].mxu1 }
 0x233   :  { %v250_v22 = vadd.f32 %v361_v20, %v249_v21  ;;  %v401_v23 = vpop.f32.mrb[1].mxu1 }
 0x234   :  { %v252_v24 = vpop.f32.mrb[2].mxu1 }
 0x235   :  { %v255_v25 = vmax.f32 %v250_v22, 0.0  ;;  %v402_v26 = vpop.f32.mrb[3].mxu1 }
 0x237   :  { %v256_v27 = vpack.c.bf16 %v255_v25, %v255_v25 }
 0x239   :  { %412 = vmatmul.mubr.msk.bf16.vlgmr.msra.gmra.mrb[4].mxu0 %vm211_vm3, %v256_v27 }
 0x30c   :  { %v333_v29 = vpop.f32.mrb[4].mxu0 }
 0x30d   :  { %v334_v30 = vadd.f32 %v367_v28, %v333_v29  ;;  %v413_v31 = vpop.f32.mrb[5].mxu0 }
 0x30e   :  { %v336_v32 = vpop.f32.mrb[6].mxu0 }
 0x30f   :  { %v414_v33 = vpop.f32.mrb[7].mxu0  ;;  %340 = vst.msk [vmem:[#allocation14] sm:$0xff] %vm339_vm4, %v334_v30 }
 0x310   :  { %600 = shalt.err (!%p597_p4)
}
 0x311   :  { %s601_s3 = scalar_lea.hbm %s788_s7, 128 }
 0x312   :  { %p602_p5 = scmp.ne.s32.totalorder %s788_s7, %s601_s3  ;;  %p605_p6 = scmp.lt.u32.totalorder %s601_s3, %s788_s7 }
 0x314   :  { %p607_p7 = pnand %p605_p6, %p602_p5 }
 0x316   :  { %610 = shalt.err (!%p607_p7)
}
 0x317   :  { %350 = dma.vmem_to_hbm [thread:$0]  %s348_s13, 128, %s788_s7, [#allocation4]  }
 0x318   :  { %619 = dma.done.wait [#allocation4], 128  }
 0x319   :  { %620 = vsyncadd [#allocation4], 4294967168 }
 0x31a   :  { %354 = vsyncpa [#allocation3], 1 }
 0x31b   :  { %355 = vsyncpa [#allocation6], 1 }
 0x31c   :  { %356 = vsyncpa [#allocation9], 1 }
 0x31d   :  { %357 = vsyncpa [#allocation12], 1 }
 0x31e   :  { %358 = vsyncpa [#allocation4], 1 }

</bundles_post_ra>
